<compile_context>
chip_gen: v6e
topology: v6e:2x2x1
jax: 0.10.0
libtpu: 0.0.40
codegen_flags: <defaults>
</compile_context>

<pallas_src>
import jax
import jax.numpy as jnp
from jax.experimental import pallas as pl
from jax.experimental.pallas import tpu as pltpu


def _sigmoid_mul_kernel(gate_ref, x_ref, o_ref):
    # gate_ref: (CB, 1) raw gate logits; x_ref / o_ref: (CB, HW)
    g = jax.nn.sigmoid(gate_ref[...].astype(jnp.float32))   # f32 sigmoid (EUP)
    # f32 gate * (f32|bf16) features -> f32 accumulate, cast to output dtype.
    o_ref[...] = (g * x_ref[...]).astype(o_ref.dtype)


def sigmoid_mul(x568, x564):
    """x568: (N, C, 1, 1) gate logits; x564: (N, C, H, W) features.
    Returns sigmoid(x568) * x564 with shape (N, C, H, W)."""
    n, c, h, w = x564.shape
    assert x568.shape == (n, c, 1, 1)
    nc = n * c          # fold batch into the channel axis
    hw = h * w

    gate2d = x568.reshape(nc, 1)
    x2d = x564.reshape(nc, hw)

    # Split channels into 2 grid blocks when the per-block sublane count stays a
    # legal multiple (8 for 32-bit, 16 for 16-bit dtypes); otherwise one block.
    sub = 16 if jnp.dtype(x564.dtype).itemsize == 2 else 8
    num_blocks = 2 if (nc % (2 * sub) == 0) else 1
    cb = nc // num_blocks

    out2d = pl.pallas_call(
        _sigmoid_mul_kernel,
        out_shape=jax.ShapeDtypeStruct((nc, hw), x564.dtype),
        grid=(num_blocks,),
        in_specs=[
            pl.BlockSpec((cb, 1), lambda i: (i, 0)),     # per-channel gate
            pl.BlockSpec((cb, hw), lambda i: (i, 0)),    # feature tile (full HW)
        ],
        out_specs=pl.BlockSpec((cb, hw), lambda i: (i, 0)),
        compiler_params=pltpu.CompilerParams(
            dimension_semantics=("parallel",)),          # 2 TCs on v7x; no-op otherwise
    )(gate2d, x2d)

    return out2d.reshape(n, c, h, w)


if __name__ == "__main__":
    key = jax.random.PRNGKey(0)
    k1, k2 = jax.random.split(key)
    # Small shapes consistent with the module (module uses N=1, C=1824, 7x7).
    # Use N=2 to exercise batch folding and C=64 so the 2-way channel split runs.
    x564 = jax.random.normal(k1, (2, 64, 7, 7), dtype=jnp.float32)
    x568 = jax.random.normal(k2, (2, 64, 1, 1), dtype=jnp.float32)

    out = sigmoid_mul(x568, x564)
    jax.block_until_ready(out)

    ref = jax.nn.sigmoid(x568) * x564
    assert out.shape == ref.shape == (2, 64, 7, 7)
    assert jnp.allclose(out, ref, atol=1e-6, rtol=1e-6)
    print("KERNEL_OK")
</pallas_src>

<mosaic_0001>
module attributes {stable_mosaic.version = 11 : i64} {
  func.func @_sigmoid_mul_kernel(%arg0: i32, %arg1: memref<64x1xf32, #tpu.memory_space<vmem>>, %arg2: memref<64x49xf32, #tpu.memory_space<vmem>>, %arg3: memref<64x49xf32, #tpu.memory_space<vmem>>) attributes {dimension_semantics = [#tpu.dimension_semantics<parallel>], iteration_bounds = array<i64: 2>, scalar_prefetch = 0 : i64, scratch_operands = 0 : i64, tpu.core_type = #tpu.core_type<tc>, window_params = [{transform_indices = @transform_0, window_bounds = array<i64: 64, 1>}, {transform_indices = @transform_1, window_bounds = array<i64: 64, 49>}, {transform_indices = @transform_2, window_bounds = array<i64: 64, 49>}]} {
    %c0 = arith.constant 0 : index
    %c0_0 = arith.constant 0 : index
    %0 = vector.load %arg1[%c0, %c0_0] : memref<64x1xf32, #tpu.memory_space<vmem>>, vector<64x1xf32>
    %1 = arith.negf %0 : vector<64x1xf32>
    %2 = math.exp %1 : vector<64x1xf32>
    %cst = arith.constant 1.000000e+00 : f32
    %3 = vector.broadcast %cst : f32 to vector<64x1xf32>
    %4 = arith.addf %3, %2 : vector<64x1xf32>
    %5 = arith.divf %3, %4 : vector<64x1xf32>
    %c0_1 = arith.constant 0 : index
    %c0_2 = arith.constant 0 : index
    %6 = vector.load %arg2[%c0_1, %c0_2] : memref<64x49xf32, #tpu.memory_space<vmem>>, vector<64x49xf32>
    %7 = vector.broadcast %5 : vector<64x1xf32> to vector<64x49xf32>
    %8 = arith.mulf %7, %6 : vector<64x49xf32>
    %c0_3 = arith.constant 0 : index
    %c0_4 = arith.constant 0 : index
    %9 = vector.load %arg3[%c0_3, %c0_4] : memref<64x49xf32, #tpu.memory_space<vmem>>, vector<64x49xf32>
    tpu.vector_store %arg3[%c0_3, %c0_4], %8 {strides = array<i32>} : memref<64x49xf32, #tpu.memory_space<vmem>>, vector<64x49xf32>,
    return
  }
  func.func @transform_0(%arg0: i32) -> (i32, i32) {
    %c0_i32 = arith.constant 0 : i32
    %c0_i32_0 = arith.constant 0 : i32
    return %arg0, %c0_i32 : i32, i32
  }
  func.func @transform_1(%arg0: i32) -> (i32, i32) {
    %c0_i32 = arith.constant 0 : i32
    %c0_i32_0 = arith.constant 0 : i32
    return %arg0, %c0_i32 : i32, i32
  }
  func.func @transform_2(%arg0: i32) -> (i32, i32) {
    %c0_i32 = arith.constant 0 : i32
    %c0_i32_0 = arith.constant 0 : i32
    return %arg0, %c0_i32 : i32, i32
  }
}

</mosaic_0001>

<bundles_post_ra>
// kernel: tpu_custom_call.1
= control target key start
LH: loop header
LB: loop body
LE: loop exit
PB: predicated region body
PF: predicated region fallthrough
CT: control target
= control target key end

     0   :  { %s446_s9 = smov 0   ;;  %s489_s0 = inlined_call_operand.vmem [shape: f32[128,1], index: 0, kind: input, shape index: {}]   ;;  %s490_s1 = inlined_call_operand.vmem [shape: f32[128,49], index: 1, kind: input, shape index: {}]   ;;  %s491_s2 = inlined_call_operand.vmem [shape: f32[128,49], index: 2, kind: output, shape index: {}]  }
   0x1 LB: > { %s358_s10 = sadd.s32 4294967295, %s428_s9   ;;  %p362_p0 = scmp.ge.s32.totalorder %s428_s9, 1  ;;  %s428_s9 = sphi %s446_s9, %s12_s9  }
   0x2   : > { %p124_p1 = scmp.lt.s32.totalorder %s428_s9, 3 }
   0x4   : > { %p125_p2 = pnand %p362_p0, %p124_p1 }
   0x5   : > { %s363_s11 = sshll.u32 (!%p125_p2), %s358_s10, 3 }
   0x6   : > { %128 = sbr.rel (%p125_p2) target bundleno = 187 (0xbb), region = 28  ;;  %p152_p3 = scmp.lt.s32.totalorder (!%p125_p2), %s363_s11, 15 }
   0xb   : > { %v430_v0 = vmov 0   ;;  %s493_s11 = smov (!%p152_p3, %s363_s11), 15  ;;  %vm281_vm0 = vcmask 400384  }
   0xc   : > { %389 = vset.pattern.permute.xlu1 %v430_v0  ;;  %388 = vset.pattern.permute.xlu0 %v430_v0  ;;  %s454_s12 = sshll.u32 %s493_s11, 3 }
   0xd   : > { %s155_s15 = scalar_lea.vmem %s489_s0, %s454_s12  ;;  %s161_s18 = scalar_lea.vmem %s490_s1, %s454_s12 }
   0xe   : > { %v171_v1 = vld [vmem:[%s155_s15 + $0x10] sm:$0xff]  ;;  %v169_v2 = vld [vmem:[%s155_s15] sm:$0xff]  ;;  %v172_v3 = vld [vmem:[%s155_s15 + $0x18] sm:$0xff]  ;;  %s468_s21 = scalar_lea.vmem %s491_s2, %s454_s12 }
   0xf   : > { %v371_v4 = vmul.f32 -1.442695, %v171_v1  ;;  %v369_v5 = vmul.f32 -1.442695, %v169_v2  ;;  %v372_v6 = vmul.f32 -1.442695, %v172_v3 }
  0x10   : > { %v170_v7 = vld [vmem:[%s155_s15 + $0x8] sm:$0xff]  ;;  %v173_v9 = vld [vmem:[%s155_s15 + $0x20] sm:$0xff]  ;;  %v176_v13 = vld [vmem:[%s155_s15 + $0x38] sm:$0xff] }
  0x11   : > { %v174_v8 = vld [vmem:[%s155_s15 + $0x28] sm:$0xff]  ;;  %390 = vpow2.f32 %v371_v4  ;;  %v370_v10 = vmul.f32 -1.442695, %v170_v7  ;;  %v373_v12 = vmul.f32 -1.442695, %v173_v9  ;;  %v175_v14 = vld [vmem:[%s155_s15 + $0x30] sm:$0xff] }
  0x12   : > { %v374_v11 = vmul.f32 -1.442695, %v174_v8  ;;  %392 = vpow2.f32 %v369_v5  ;;  %v376_v15 = vmul.f32 -1.442695, %v176_v13  ;;  %v375_v16 = vmul.f32 -1.442695, %v175_v14 }
  0x13   : > { %394 = vpow2.f32 %v372_v6  ;;  %v227_v41 = vld [vmem:[%s161_s18 + $0x10] sm:$0xff]  ;;  %v225_v42 = vld [vmem:[%s161_s18] sm:$0xff]  ;;  %v228_v47 = vld [vmem:[%s161_s18 + $0x18] sm:$0xff] }
  0x14   : > { %396 = vpow2.f32 %v370_v10  ;;  %v226_v48 = vld [vmem:[%s161_s18 + $0x8] sm:$0xff]  ;;  %v229_v54 = vld [vmem:[%s161_s18 + $0x20] sm:$0xff]  ;;  %v232_v59 = vld [vmem:[%s161_s18 + $0x38] sm:$0xff] }
  0x15   : > { %398 = vpow2.f32 %v374_v11  ;;  %v230_v53 = vld [vmem:[%s161_s18 + $0x28] sm:$0xff]  ;;  %v231_v60 = vld [vmem:[%s161_s18 + $0x30] sm:$0xff] }
  0x16   : > { %400 = vpow2.f32 %v373_v12 }
  0x17   : > { %402 = vpow2.f32 %v376_v15 }
  0x18   : > { %404 = vpow2.f32 %v375_v16 }
  0x1e   : > { %v391_v17 = vpop.eup %390 }
  0x1f   : > { %v393_v18 = vpop.eup %392  ;;  %v203_v19 = vadd.f32 1.0, %v391_v17 }
  0x20   : > { %v395_v20 = vpop.eup %394  ;;  %v201_v21 = vadd.f32 1.0, %v393_v18 }
  0x21   : > { %v397_v22 = vpop.eup %396  ;;  %406 = vrcp.f32 %v203_v19  ;;  %v204_v23 = vadd.f32 1.0, %v395_v20 }
  0x22   : > { %v399_v24 = vpop.eup %398  ;;  %408 = vrcp.f32 %v201_v21  ;;  %v202_v25 = vadd.f32 1.0, %v397_v22 }
  0x23   : > { %v401_v26 = vpop.eup %400  ;;  %410 = vrcp.f32 %v204_v23  ;;  %v206_v27 = vadd.f32 1.0, %v399_v24 }
  0x24   : > { %v403_v28 = vpop.eup %402  ;;  %412 = vrcp.f32 %v202_v25  ;;  %v205_v29 = vadd.f32 1.0, %v401_v26 }
  0x25   : > { %v405_v30 = vpop.eup %404  ;;  %414 = vrcp.f32 %v206_v27  ;;  %v208_v31 = vadd.f32 1.0, %v403_v28 }
  0x26   : > { %416 = vrcp.f32 %v205_v29  ;;  %v207_v32 = vadd.f32 1.0, %v405_v30 }
  0x27   : > { %418 = vrcp.f32 %v208_v31 }
  0x28   : > { %420 = vrcp.f32 %v207_v32 }
  0x2e   : > { %v407_v33 = vpop.eup %406 }
  0x2f   : > { %v409_v34 = vpop.eup %408  ;;  %245 = vperm.xlu1 %389, %v407_v33  }
  0x30   : > { %v411_v35 = vpop.eup %410  ;;  %235 = vperm.xlu0 %388, %v409_v34  }
  0x31   : > { %v413_v36 = vpop.eup %412 }
  0x32   : > { %v415_v37 = vpop.eup %414 }
  0x33   : > { %250 = vperm.xlu1 %389, %v411_v35   ;;  %v417_v38 = vpop.eup %416 }
  0x34   : > { %240 = vperm.xlu0 %388, %v413_v36   ;;  %v419_v39 = vpop.eup %418 }
  0x35   : > { %v421_v40 = vpop.eup %420 }
  0x37   : > { %260 = vperm.xlu1 %389, %v415_v37  }
  0x38   : > { %255 = vperm.xlu0 %388, %v417_v38  }
  0x3b   : > { %270 = vperm.xlu1 %389, %v419_v39  }
  0x3c   : > { %265 = vperm.xlu0 %388, %v421_v40  }
  0xaa   : > { %v246_v43 = vpop.permute.xlu1 %245 }
  0xab   : > { %v275_v44 = vmul.f32 %v246_v43, %v227_v41  ;;  %v236_v45 = vpop.permute.xlu0 %235 }
  0xac   : > { %v273_v46 = vmul.f32 %v236_v45, %v225_v42 }
  0xad   : > { %284 = vst.msk [vmem:[%s468_s21 + $0x10] sm:$0xff] %vm281_vm0, %v275_v44 }
  0xae   : > { %282 = vst.msk [vmem:[%s468_s21] sm:$0xff] %vm281_vm0, %v273_v46  ;;  %v251_v49 = vpop.permute.xlu1 %250 }
  0xaf   : > { %v276_v50 = vmul.f32 %v251_v49, %v228_v47  ;;  %v241_v51 = vpop.permute.xlu0 %240 }
  0xb0   : > { %v274_v52 = vmul.f32 %v241_v51, %v226_v48 }
  0xb1   : > { %285 = vst.msk [vmem:[%s468_s21 + $0x18] sm:$0xff] %vm281_vm0, %v276_v50 }
  0xb2   : > { %283 = vst.msk [vmem:[%s468_s21 + $0x8] sm:$0xff] %vm281_vm0, %v274_v52  ;;  %v261_v55 = vpop.permute.xlu1 %260 }
  0xb3   : > { %v278_v56 = vmul.f32 %v261_v55, %v230_v53  ;;  %v256_v57 = vpop.permute.xlu0 %255 }
  0xb4   : > { %v277_v58 = vmul.f32 %v256_v57, %v229_v54 }
  0xb5   : > { %287 = vst.msk [vmem:[%s468_s21 + $0x28] sm:$0xff] %vm281_vm0, %v278_v56 }
  0xb6   : > { %286 = vst.msk [vmem:[%s468_s21 + $0x20] sm:$0xff] %vm281_vm0, %v277_v58  ;;  %v271_v61 = vpop.permute.xlu1 %270 }
  0xb7   : > { %v280_v62 = vmul.f32 %v271_v61, %v232_v59  ;;  %v266_v63 = vpop.permute.xlu0 %265 }
  0xb8   : > { %v279_v0 = vmul.f32 %v266_v63, %v231_v60 }
  0xb9   : > { %289 = vst.msk [vmem:[%s468_s21 + $0x38] sm:$0xff] %vm281_vm0, %v280_v62 }
  0xba   : > { %288 = vst.msk [vmem:[%s468_s21 + $0x30] sm:$0xff] %vm281_vm0, %v279_v0 }
  0xbb PF: > { %s12_s9 = sadd.s32 1, %s428_s9  }
  0xbc   : > { %p9_p4 = scmp.ge.s32.totalorder %s12_s9, 4  }
  0xbe   :  { %11 = sbr.rel (!%p9_p4) target bundleno = 1 (0x1), region = 61 }

</bundles_post_ra>
